<compile_context>
chip_gen: v7x
topology: tpu7x:2x2x1
jax: 0.10.0
libtpu: 0.0.40
codegen_flags: <defaults>
</compile_context>

<pallas_src>
import functools

import jax
import jax.numpy as jnp
from jax.experimental import pallas as pl
from jax.experimental.pallas import tpu as pltpu


def _fused_leaky_relu_kernel(x_ref, b_ref, o_ref, *, pos_scale, neg_scale):
    # x_ref: (TR, TL) block of the flattened (N*C, H*W) input
    # b_ref: (TR, 1) per-row bias (f32), broadcast over lanes
    v = x_ref[...].astype(jnp.float32) + b_ref[...]
    out = v * jnp.where(v >= 0, pos_scale, neg_scale)   # scale folded into select
    o_ref[...] = out.astype(o_ref.dtype)


def _round_up(a, m):
    return (a + m - 1) // m * m


def _vmem_capacity_bytes():
    try:
        return int(pltpu.get_tpu_info().vmem_capacity_bytes)
    except Exception:
        return 64 << 20   # conservative: assume v7x-sized per-core VMEM


def _largest_divisor_leq(n, cap):
    """Largest divisor of n that is <= cap (n, cap >= 1)."""
    cap = min(cap, n)
    best = 1
    i = 1
    while i * i <= n:
        if n % i == 0:
            lo, hi = i, n // i
            if lo <= cap and lo > best:
                best = lo
            if hi <= cap and hi > best:
                best = hi
        i += 1
    return best


def _choose_tiles(R, L, itemsize, target_bytes):
    """Pick (row_tile, lane_tile, row_align) for ~target_bytes lane-dense blocks."""
    # sublane packing: f32 -> 8 rows, bf16/f16 -> 16, int8/fp8 -> 32
    row_align = {4: 8, 2: 16, 1: 32}.get(itemsize, 8)
    R_pad = _round_up(R, row_align)
    L_pad = _round_up(L, 128)
    target_elems = max(row_align * 128, target_bytes // itemsize)

    if row_align * L_pad <= target_elems:
        # Full lane extent fits in one block: never tile lanes (lane-dense,
        # no masked-store tails); grow the row tile toward the target.
        TL = L
        TR = min(R_pad, max(row_align,
                            (target_elems // L_pad) // row_align * row_align))
    else:
        # Rows are very wide (small R, huge H*W): keep the row tile at the
        # minimum aligned height and re-grow the lane tile to the target.
        TR = row_align
        max_units = max(1, (target_elems // TR) // 128)   # lane tile, 128-lane units
        n_units = L_pad // 128
        div_units = _largest_divisor_leq(n_units, max_units)
        # Prefer a tile that divides the lane extent exactly (no ragged tail)
        # unless that would shrink the block by more than 2x.
        units = div_units if 2 * div_units >= max_units else max_units
        TL = units * 128
    return TR, TL, row_align


def _ensure_two_blocks(TR, TL, R, L, row_align):
    """Split one axis so the grid has >= 2 blocks (v7x: feed both TensorCores)."""
    if pl.cdiv(R, TR) * pl.cdiv(L, TL) >= 2:
        return TR, TL
    if TL >= 256:
        half = _round_up(TL // 2, 128)
        if pl.cdiv(L, half) >= 2:
            return TR, half
    if TR >= 2 * row_align:
        half = _round_up(TR // 2, row_align)
        if pl.cdiv(R, half) >= 2:
            return half, TL
    return TR, TL


def fused_leaky_relu(x, bias, negative_slope=0.2, scale=2 ** 0.5):
    """x: (N, C, H, W), bias: (C,) -> (N, C, H, W)"""
    N, C, H, W = x.shape
    assert bias.shape == (C,)

    R = N * C          # rows: channels stacked over batch (sublane axis)
    L = H * W          # lanes: spatial (last, fast axis)

    x2d = x.reshape(R, L)
    # row r = (n, c) gets bias[c]; keep in f32 so the add is full precision
    b2d = jnp.tile(bias.astype(jnp.float32), N).reshape(R, 1)

    itemsize = jnp.dtype(x.dtype).itemsize

    # Generation-aware block target / VMEM cap.
    vmem_capacity = _vmem_capacity_bytes()
    if vmem_capacity >= (100 << 20):      # v5e / v6e: 128 MiB VMEM, single TC
        target_bytes, vmem_cap, force_two_blocks = 8 << 20, 96 << 20, False
    else:                                 # v7x: 64 MiB per TC, 2 TCs share HBM
        target_bytes, vmem_cap, force_two_blocks = 4 << 20, 48 << 20, True

    TR, TL, row_align = _choose_tiles(R, L, itemsize, target_bytes)
    if force_two_blocks:
        TR, TL = _ensure_two_blocks(TR, TL, R, L, row_align)

    grid = (pl.cdiv(R, TR), pl.cdiv(L, TL))

    # VMEM budget: double-buffered (lane-padded) x + out blocks, bias block
    # (lane-padded to 128, f32), plus a small slack for Mosaic internals.
    TL_pad = _round_up(TL, 128)
    blk = TR * TL_pad * itemsize
    bias_blk = TR * 128 * 4
    vmem = 2 * blk + 2 * blk + 2 * bias_blk + (2 << 20)
    vmem = int(min(max(vmem, 8 << 20), vmem_cap))

    kernel = functools.partial(
        _fused_leaky_relu_kernel,
        pos_scale=float(scale),
        neg_scale=float(scale) * float(negative_slope),
    )

    out2d = pl.pallas_call(
        kernel,
        out_shape=jax.ShapeDtypeStruct((R, L), x.dtype),
        grid_spec=pltpu.PrefetchScalarGridSpec(
            num_scalar_prefetch=0,
            grid=grid,
            in_specs=[
                pl.BlockSpec((TR, TL), lambda i, j: (i, j)),
                pl.BlockSpec((TR, 1), lambda i, j: (i, 0)),
            ],
            out_specs=pl.BlockSpec((TR, TL), lambda i, j: (i, j)),
        ),
        compiler_params=pltpu.CompilerParams(
            dimension_semantics=("parallel", "parallel"),
            vmem_limit_bytes=vmem,
        ),
    )(x2d, b2d)

    return out2d.reshape(N, C, H, W)


class FusedLeakyReLU:
    """JAX/Pallas port of the PyTorch FusedLeakyReLU module."""

    def __init__(self, channel, negative_slope=0.2, scale=2 ** 0.5, key=None):
        # nn.Parameter(torch.zeros(channel)); draw small deterministic values
        # when a key is given so the bias path is actually exercised.
        if key is None:
            self.bias = jnp.zeros((channel,), jnp.float32)
        else:
            self.bias = 0.1 * jax.random.normal(key, (channel,), jnp.float32)
        self.negative_slope = negative_slope
        self.scale = scale

    def __call__(self, x):
        return fused_leaky_relu(x, self.bias, self.negative_slope, self.scale)


def _reference(x, bias, negative_slope=0.2, scale=2 ** 0.5):
    v = x + bias.reshape((1, -1) + (1,) * (x.ndim - 2))
    return scale * jnp.where(v >= 0, v, negative_slope * v)


if __name__ == "__main__":
    key = jax.random.PRNGKey(0)
    kx, kb, kx2, kx3 = jax.random.split(key, 4)

    # Main test: small shape consistent with the module.
    N, C, H, W = 2, 4, 16, 16
    x = jax.random.normal(kx, (N, C, H, W), jnp.float32)
    module = FusedLeakyReLU(C, key=kb)
    out = jax.block_until_ready(module(x))
    ref = _reference(x, module.bias, module.negative_slope, module.scale)
    assert out.shape == (N, C, H, W)
    assert jnp.allclose(out, ref, atol=1e-6, rtol=1e-6), "mismatch vs reference"

    # Secondary test: larger lane extent (L = 48*48 = 2304), small row count —
    # exercises the full-lane-extent branch and the v7x two-block split path.
    x2 = jax.random.normal(kx2, (1, 2, 48, 48), jnp.float32)
    module2 = FusedLeakyReLU(2, key=kb)
    out2 = jax.block_until_ready(module2(x2))
    ref2 = _reference(x2, module2.bias, module2.negative_slope, module2.scale)
    assert jnp.allclose(out2, ref2, atol=1e-6, rtol=1e-6), "mismatch (large-L tiling)"

    # Third test: rows and lanes not multiples of (8, 128) — exercises edge
    # masking on both axes.
    x3 = jax.random.normal(kx3, (2, 3, 10, 10), jnp.float32)
    module3 = FusedLeakyReLU(3, key=kb)
    out3 = jax.block_until_ready(module3(x3))
    ref3 = _reference(x3, module3.bias, module3.negative_slope, module3.scale)
    assert jnp.allclose(out3, ref3, atol=1e-6, rtol=1e-6), "mismatch (ragged edges)"

    print("KERNEL_OK")
</pallas_src>

<mosaic_0001>
module attributes {stable_mosaic.version = 11 : i64} {
  func.func @_fused_leaky_relu_kernel(%arg0: i32, %arg1: i32, %arg2: memref<8x128xf32, #tpu.memory_space<vmem>>, %arg3: memref<8x1xf32, #tpu.memory_space<vmem>>, %arg4: memref<8x128xf32, #tpu.memory_space<vmem>>) attributes {dimension_semantics = [#tpu.dimension_semantics<parallel>, #tpu.dimension_semantics<parallel>], iteration_bounds = array<i64: 1, 2>, scalar_prefetch = 0 : i64, scratch_operands = 0 : i64, tpu.core_type = #tpu.core_type<tc>, window_params = [{transform_indices = @transform_0, window_bounds = array<i64: 8, 128>}, {transform_indices = @transform_1, window_bounds = array<i64: 8, 1>}, {transform_indices = @transform_2, window_bounds = array<i64: 8, 128>}]} {
    %c0 = arith.constant 0 : index
    %c0_0 = arith.constant 0 : index
    %0 = vector.load %arg2[%c0, %c0_0] : memref<8x128xf32, #tpu.memory_space<vmem>>, vector<8x128xf32>
    %c0_1 = arith.constant 0 : index
    %c0_2 = arith.constant 0 : index
    %1 = vector.load %arg3[%c0_1, %c0_2] : memref<8x1xf32, #tpu.memory_space<vmem>>, vector<8x1xf32>
    %2 = vector.broadcast %1 : vector<8x1xf32> to vector<8x128xf32>
    %3 = arith.addf %0, %2 : vector<8x128xf32>
    %cst = arith.constant 0.000000e+00 : f32
    %4 = vector.broadcast %cst : f32 to vector<8x128xf32>
    %5 = arith.cmpf oge, %3, %4 : vector<8x128xf32>
    %cst_3 = arith.constant 1.41421354 : f32
    %cst_4 = arith.constant 0.282842726 : f32
    %6 = vector.broadcast %cst_3 : f32 to vector<8x128xf32>
    %7 = vector.broadcast %cst_4 : f32 to vector<8x128xf32>
    %8 = arith.select %5, %6, %7 : vector<8x128xi1>, vector<8x128xf32>
    %9 = arith.mulf %3, %8 : vector<8x128xf32>
    %c0_5 = arith.constant 0 : index
    %c0_6 = arith.constant 0 : index
    %10 = vector.load %arg4[%c0_5, %c0_6] : memref<8x128xf32, #tpu.memory_space<vmem>>, vector<8x128xf32>
    tpu.vector_store %arg4[%c0_5, %c0_6], %9 {strides = array<i32>} : memref<8x128xf32, #tpu.memory_space<vmem>>, vector<8x128xf32>,
    return
  }
  func.func @transform_0(%arg0: i32, %arg1: i32) -> (i32, i32) {
    %c0_i32 = arith.constant 0 : i32
    return %arg0, %arg1 : i32, i32
  }
  func.func @transform_1(%arg0: i32, %arg1: i32) -> (i32, i32) {
    %c0_i32 = arith.constant 0 : i32
    %c0_i32_0 = arith.constant 0 : i32
    return %arg0, %c0_i32 : i32, i32
  }
  func.func @transform_2(%arg0: i32, %arg1: i32) -> (i32, i32) {
    %c0_i32 = arith.constant 0 : i32
    return %arg0, %arg1 : i32, i32
  }
}

</mosaic_0001>

<bundles_post_ra>
// kernel: tpu_custom_call.1
= control target key start
LH: loop header
LB: loop body
LE: loop exit
PB: predicated region body
PF: predicated region fallthrough
CT: control target
= control target key end

     0   :  { %7 = vsyncpa [#allocation3], 0  ;;  %s706_s0 = inlined_call_operand.hbm [shape: f32[8,256], index: 0, kind: input, shape index: {}]   ;;  %s707_s1 = inlined_call_operand.vmem [shape: f32[8,1], index: 1, kind: input, shape index: {}]   ;;  %s708_s2 = inlined_call_operand.hbm [shape: f32[8,256], index: 2, kind: output, shape index: {}]  }
   0x1   :  { %9 = vsyncpa [#allocation3 + $0x1], 0 }
   0x2   :  { %10 = vsyncpa [#allocation4], 0 }
   0x3   :  { %12 = vsyncpa [#allocation4 + $0x1], 0  ;;  %s531_s9 = smov 0   ;;  %s533_s10 = smov 0  }
   0x4   :  { %s535_s11 = smov 0   ;;  %s537_s12 = smov 0  }
   0x5   :  { %s539_s13 = smov 0   ;;  %s541_s14 = smov 0  }
   0x6 LB: > { %s319_s15 = sadd.s32 4294967295, %s510_s14   ;;  %s320_s16 = sadd.s32 4294967294, %s510_s14   ;;  %s510_s14 = sphi %s541_s14, %s18_s14   ;;  %s506_s13 = sphi %s539_s13, %s724_s13   ;;  %s502_s12 = sphi %s537_s12, %s723_s12   ;;  %s498_s11 = sphi %s535_s11, %s722_s11   ;;  %s494_s10 = sphi %s533_s10, %s721_s10   ;;  %s490_s9 = sphi %s531_s9, %s720_s9  }
   0x7   : > { %s27_s17 = sadd.s32 1, %s506_s13  ;;  %s39_s18 = sadd.s32 1, %s498_s11 }
   0x8   : > { %p28_p0 = scmp.ge.s32.totalorder %s27_s17, 2  ;;  %p46_p1 = scmp.ne.s32.totalorder %s498_s11, %s494_s10 }
   0x9   : > { %p47_p2 = scmp.eq.s32.totalorder %s510_s14, 0  ;;  %p52_p3 = scmp.ne.s32.totalorder %s494_s10, %s490_s9 }
   0xa   : > { %s726_s17 = smov (%p28_p0, %s27_s17), 0  ;;  %p53_p5 = scmp.eq.s32.totalorder %s319_s15, 0 }
   0xb   : > { %p572_p4 = por %p47_p2, %p46_p1  ;;  %s35_s20 = ssub.s32 %s506_s13, %s726_s17 }
   0xc   : > { %p104_p6 = scmp.eq.s32.totalorder %s319_s15, 1  ;;  %p37_p7 = scmp.eq.s32.totalorder %s35_s20, 0 }
   0xd   : > { %p578_p8 = por %p53_p5, %p52_p3  ;;  %p110_p10 = scmp.eq.s32.totalorder %s320_s16, 1 }
   0xe   : > { %p582_p9 = por %p104_p6, %p46_p1  ;;  %p345_p13 = scmp.lt.s32.totalorder %s510_s14, 2 }
   0xf   : > { %s587_s23 = scalar_select %p37_p7, %s498_s11, %s39_s18  }
  0x10   : > { %s712_s22 = scalar_select %p582_p9, 1, 0 }
  0x11   : > { %p589_p11 = por %p110_p10, %p52_p3  ;;  %s137_s25 = sand.u32 1, %s498_s11  }
  0x12   : > { %s324_s26 = sshll.u32 %s137_s25, 3  ;;  %s325_s27 = sshll.u32 %s506_s13, 7 }
  0x13   : > { %s713_s24 = scalar_select %p589_p11, 1, 0 }
  0x14   : > { %s600_s30 = scalar_lea.hbm %s706_s0, %s325_s27  ;;  %s141_s3 = scalar_lea.vmem [#allocation2], %s324_s26 }
  0x15   : > { %s150_s4 = sshll.u32 %s141_s3, 4  ;;  %p606_p0 = pnand %p345_p13, %p572_p4  ;;  %s602_s4 = int_to_ptr.vmem [resolvable:$true] %s150_s4 }
  0x16   : > { %s138_s6 = scalar_lea.sflag [#allocation3], %s137_s25  ;;  %s398_s7 = scalar_lea.hbm %s600_s30, 128 }
  0x17   : > { %p399_p3 = scmp.ne.s32.totalorder %s600_s30, %s398_s7  ;;  %p400_p5 = pneg %p606_p0 }
  0x18   : > { %s403_s16 = scalar_lea.hbm %s706_s0, 256  ;;  %p404_p4 = scmp.lt.u32.totalorder %s600_s30, %s706_s0 }
  0x19   : > { %p401_p6 = pnand %p400_p5, %p399_p3  ;;  %p405_p10 = scmp.lt.u32.totalorder %s403_s16, %s398_s7 }
  0x1a   : > { %p407_p12 = scmp.lt.u32.totalorder %s398_s7, %s600_s30 }
  0x1b   : > { %p402_p7 = pneg %p401_p6  ;;  %p406_p13 = por %p405_p10, %p404_p4 }
  0x1d   : > { %p408_p1 = por %p407_p12, %p406_p13 }
  0x1f   : > { %p409_p2 = pnand %p408_p1, %p402_p7 }
  0x21   : > { %412 = shalt.err (!%p409_p2)
}
  0x22   : > { %s413_s20 = scalar_lea.vmem %s602_s4, 128  ;;  %s512_s25 = smov [#allocation2]  }
  0x23   : > { %p414_p3 = scmp.ne.s32.totalorder %s602_s4, %s413_s20  ;;  %s418_s26 = sshll.u32 %s512_s25, 4  ;;  %s419_s26 = int_to_ptr.vmem [resolvable:$false] %s418_s26 }
  0x24   : > { %s420_s27 = scalar_lea.vmem %s419_s26, 256  ;;  %p421_p9 = scmp.lt.s32.totalorder %s602_s4, %s419_s26 }
  0x25   : > { %p416_p6 = pnand %p414_p3, %p400_p5  ;;  %p422_p4 = scmp.lt.s32.totalorder %s420_s27, %s413_s20 }
  0x27   : > { %p417_p11 = pneg %p416_p6  ;;  %p423_p10 = por %p422_p4, %p421_p9 }
  0x29   : > { %p424_p12 = pnand %p423_p10, %p417_p11 }
  0x2b   : > { %427 = shalt.err (!%p424_p12)
}
  0x2c   : > { %340 = dma.hbm_to_vmem [thread:$0]  (!%p606_p0), %s600_s30, 128, %s602_s4, %s138_s6  }
  0x2d   : > { %p715_p1 = scmp.lt.s32.totalorder %s510_s14, 3  ;;  %p716_p2 = scmp.ge.s32.totalorder %s510_s14, 1 }
  0x2f   : > { %p156_p5 = pnand %p716_p2, %p715_p1 }
  0x30   : > { %s642_s28 = sand.u32 (!%p156_p5), 1, %s494_s10  }
  0x31   : > { %159 = sbr.rel (%p156_p5) target bundleno = 207 (0xcf), region = 28  ;;  %s327_s29 = sshll.u32 (!%p156_p5), %s642_s28, 3 }
  0x32   : > { %s162_s3 = scalar_lea.sflag (!%p156_p5), [#allocation3], %s642_s28  ;;  %s165_s7 = scalar_lea.vmem (!%p156_p5), [#allocation2], %s327_s29 }
  0x38   : > { %481 = dma.done.wait (%p578_p8), %s162_s3, 128  }
  0x39   : > { %483 = vsyncadd (%p578_p8), %s162_s3, 4294967168  ;;  %v513_v0 = vmov 0   ;;  %v195_v1 = vld [vmem:[%s707_s1] sm:$0xff]  ;;  %s330_s5 = sshll.u32 %s502_s12, 7  ;;  %s189_s6 = scalar_lea.vmem [#allocation5], %s327_s29 }
  0x3a   : > { %397 = vset.pattern.permute.xlu0 %v513_v0  ;;  %v194_v2 = vld [vmem:[%s165_s7] sm:$0xff]  ;;  %s222_s8 = sshll.u32 %s189_s6, 4  ;;  %v514_v5 = vmov 0.28284273   ;;  %s657_s16 = scalar_lea.hbm %s708_s2, %s330_s5  ;;  %s659_s8 = int_to_ptr.vmem [resolvable:$true] %s222_s8 }
  0x3b   : > { %198 = vperm.xlu0 %397, %v195_v1   ;;  %s207_s18 = scalar_lea.sflag [#allocation4], %s642_s28  ;;  %s428_s19 = scalar_lea.vmem %s659_s8, 128 }
  0x3c   : > { %p429_p8 = scmp.ne.s32.totalorder %s659_s8, %s428_s19  ;;  %p717_p9 = scmp.ne.s32.totalorder %s712_s22, 0 }
  0x3d   : > { %s515_s12 = smov [#allocation5]  }
  0x3e   : > { %p430_p11 = pnand %p429_p8, %p717_p9  ;;  %s432_s20 = sshll.u32 %s515_s12, 4  ;;  %s433_s20 = int_to_ptr.vmem [resolvable:$false] %s432_s20 }
  0x3f   : > { %s434_s25 = scalar_lea.vmem %s433_s20, 256  ;;  %p435_p7 = scmp.lt.s32.totalorder %s659_s8, %s433_s20 }
  0x40   : > { %p431_p0 = pneg %p430_p11  ;;  %p436_p13 = scmp.lt.s32.totalorder %s434_s25, %s428_s19 }
  0x42   : > { %p437_p3 = por %p436_p13, %p435_p7 }
  0x44   : > { %p438_p6 = pnand %p437_p3, %p431_p0 }
  0xba   : > { %v199_v3 = vpop.permute.xlu0 %198 }
  0xbb   : > { %v201_v4 = vadd.f32 %v199_v3, %v194_v2 }
  0xbd   : > { %vm202_vm0 = vcmp.ge.f32.partialorder %v201_v4, 0.0 }
  0xbe   : > { %v203_v6 = vsel %vm202_vm0, 1.4142135, %v514_v5 }
  0xbf   : > { %v204_v7 = vmul.f32 %v203_v6, %v201_v4 }
  0xc1   : > { %205 = vst [vmem:[%s189_s6] sm:$0xff] %v204_v7 }
  0xc2   : > { %441 = shalt.err (!%p438_p6)
}
  0xc3   : > { %s442_s26 = scalar_lea.hbm %s657_s16, 128  ;;  %s446_s29 = scalar_lea.hbm %s708_s2, 256 }
  0xc4   : > { %p443_p4 = scmp.ne.s32.totalorder %s657_s16, %s442_s26  ;;  %p447_p1 = scmp.lt.u32.totalorder %s657_s16, %s708_s2 }
  0xc5   : > { %p448_p2 = scmp.lt.u32.totalorder %s446_s29, %s442_s26  ;;  %p450_p8 = scmp.lt.u32.totalorder %s442_s26, %s657_s16 }
  0xc6   : > { %p444_p10 = pnand %p443_p4, %p717_p9 }
  0xc7   : > { %p449_p5 = por %p448_p2, %p447_p1 }
  0xc8   : > { %p445_p12 = pneg %p444_p10 }
  0xc9   : > { %p451_p11 = por %p450_p8, %p449_p5 }
  0xcb   : > { %p452_p0 = pnand %p451_p11, %p445_p12 }
  0xcd   : > { %455 = shalt.err (!%p452_p0)
}
  0xce   : > { %335 = dma.vmem_to_hbm [thread:$0]  (%p717_p9), %s659_s8, 128, %s657_s16, %s207_s18  }
  0xcf PF: > { %s234_s30 = sand.u32 1, %s490_s9   ;;  %p718_p7 = scmp.ne.s32.totalorder %s713_s24, 0 }
  0xd0   : > { %p719_p13 = scmp.ge.s32.totalorder %s510_s14, 2  ;;  %s235_s4 = scalar_lea.sflag [#allocation4], %s234_s30 }
  0xd2   : > { %p342_p3 = pnand %p719_p13, %p718_p7 }
  0xd4   : > { %485 = dma.done.wait (!%p342_p3), %s235_s4, 128  }
  0xd5   : > { %487 = vsyncadd (!%p342_p3), %s235_s4, 4294967168  ;;  %s18_s14 = sadd.s32 1, %s510_s14   ;;  %s720_s9 = smov %s494_s10 }
  0xd6   : > { %p15_p6 = scmp.ge.s32.totalorder %s18_s14, 4   ;;  %s721_s10 = smov %s498_s11 }
  0xd7   : > { %s722_s11 = smov %s587_s23  ;;  %s723_s12 = smov %s506_s13 }
  0xd8   : > { %s724_s13 = smov %s726_s17  ;;  %17 = sbr.rel (!%p15_p6) target bundleno = 6 (0x6), region = 76 }
  0xdf   :  { %240 = vsyncpa [#allocation3], 1 }
  0xe0   :  { %242 = vsyncpa [#allocation3 + $0x1], 1 }
  0xe1   :  { %243 = vsyncpa [#allocation4], 1 }
  0xe2   :  { %245 = vsyncpa [#allocation4 + $0x1], 1 }

</bundles_post_ra>
